<compile_context>
chip_gen: v5e
topology: v5e:2x2
jax: 0.10.0
libtpu: 0.0.40
codegen_flags: <defaults>
</compile_context>

<pallas_src>
from functools import partial

import jax
import jax.numpy as jnp
import numpy as np
from jax import lax
from jax.experimental import pallas as pl
from jax.experimental.pallas import tpu as pltpu

EPS = 1e-6


# ---------------------------------------------------------------------------
# Kernels
# ---------------------------------------------------------------------------
def _ln_kernel(x_ref, g_ref, b_ref, o_ref, *, feat_dim, eps):
    """Plain path: one logical row per tile row (D is the full last dim)."""
    x = x_ref[...].astype(jnp.float32)                        # (TR, D)
    # One-pass statistics: two independent reductions.
    s = jnp.sum(x, axis=-1, keepdims=True)
    q = jnp.sum(x * x, axis=-1, keepdims=True)
    mean = s * (1.0 / feat_dim)
    # Unbiased variance (divide by D-1) == torch.Tensor.std() default.
    var = jnp.maximum((q - s * mean) * (1.0 / (feat_dim - 1)), 0.0)
    inv = 1.0 / (jnp.sqrt(var) + eps)           # eps OUTSIDE the sqrt (torch ref)
    o_ref[...] = (g_ref[...] * ((x - mean) * inv) + b_ref[...]).astype(o_ref.dtype)


def _ln_folded_kernel(x_ref, g_ref, b_ref, sel_ref, o_ref, *, feat_dim, eps):
    """Lane-dense path for D < 128: each tile row packs k = 128 // D logical rows
    along the lane axis; per-logical-row statistics are segmented reductions done
    as matmuls with a block-diagonal 0/1 selector on the otherwise-idle MXU."""
    x = x_ref[...].astype(jnp.float32)                        # (TR, k*D)
    sel = sel_ref[...]                                        # (k*D, k), block-diag ones
    hi = lax.Precision.HIGHEST
    s = jnp.dot(x, sel, preferred_element_type=jnp.float32, precision=hi)      # (TR, k)
    q = jnp.dot(x * x, sel, preferred_element_type=jnp.float32, precision=hi)  # (TR, k)
    mean = s * (1.0 / feat_dim)
    var = jnp.maximum((q - s * mean) * (1.0 / (feat_dim - 1)), 0.0)
    inv = 1.0 / (jnp.sqrt(var) + eps)
    # Broadcast per-segment stats back to (TR, k*D): out[r, c] = stat[r, c // D].
    dn = (((1,), (1,)), ((), ()))                             # contract the segment axes
    mean_b = lax.dot_general(mean, sel, dn,
                             preferred_element_type=jnp.float32, precision=hi)
    inv_b = lax.dot_general(inv, sel, dn,
                            preferred_element_type=jnp.float32, precision=hi)
    o_ref[...] = (g_ref[...] * ((x - mean_b) * inv_b) + b_ref[...]).astype(o_ref.dtype)


# ---------------------------------------------------------------------------
# Wrapper
# ---------------------------------------------------------------------------
def _row_tile(num_rows, row_bytes, target_block_bytes):
    """Rows per pipeline step: ~target_block_bytes of x per block, a multiple of 8,
    and at least 2 grid steps once there are enough rows (v7x megacore)."""
    if num_rows <= 64:
        return num_rows                       # single block == full array shape
    tr = max(8, (target_block_bytes // row_bytes) // 8 * 8)
    half = (((num_rows + 1) // 2) + 7) // 8 * 8
    return max(8, min(tr, half))


def layer_norm(x, gamma, beta, *, eps=EPS, target_block_bytes=2 * 1024 * 1024):
    """LayerNorm over the last axis of x; gamma/beta have shape (D,)."""
    orig_shape = x.shape
    D = int(orig_shape[-1])
    if D < 2:
        raise ValueError("Unbiased std (D-1 divisor) requires feature dim >= 2")
    N = 1
    for s in orig_shape[:-1]:
        N *= int(s)

    # Lane-dense folding: pack k = 128 // D logical rows into the lane axis when
    # D < 128 divides 128 and N splits evenly.  The reshape is contiguous (free).
    k = 1
    if D < 128 and 128 % D == 0 and N % (128 // D) == 0:
        k = 128 // D
    Dk = k * D
    Nr = N // k

    x2 = x.reshape(Nr, Dk)
    g2 = jnp.tile(gamma.astype(jnp.float32).reshape(-1), k).reshape(1, Dk)
    b2 = jnp.tile(beta.astype(jnp.float32).reshape(-1), k).reshape(1, Dk)

    itemsize = jnp.dtype(x.dtype).itemsize
    TR = _row_tile(Nr, Dk * itemsize, target_block_bytes)
    grid = (pl.cdiv(Nr, TR),)                 # ragged last block handled by Pallas

    in_specs = [
        pl.BlockSpec((TR, Dk), lambda i: (i, 0)),      # activations, row-tiled
        pl.BlockSpec((1, Dk), lambda i: (0, 0)),       # gamma (resident)
        pl.BlockSpec((1, Dk), lambda i: (0, 0)),       # beta  (resident)
    ]
    args = [x2, g2, b2]
    if k > 1:
        # Block-diagonal selector: sel[c, j] = 1 iff c // D == j.
        seg = jnp.arange(Dk, dtype=jnp.int32) // D
        sel = (seg[:, None] == jnp.arange(k, dtype=jnp.int32)[None, :]).astype(jnp.float32)
        in_specs.append(pl.BlockSpec((Dk, k), lambda i: (0, 0)))   # selector (resident)
        args.append(sel)
        kern = partial(_ln_folded_kernel, feat_dim=D, eps=eps)
    else:
        kern = partial(_ln_kernel, feat_dim=D, eps=eps)

    out = pl.pallas_call(
        kern,
        out_shape=jax.ShapeDtypeStruct((Nr, Dk), x.dtype),
        grid_spec=pltpu.PrefetchScalarGridSpec(
            num_scalar_prefetch=0,
            grid=grid,
            in_specs=in_specs,
            out_specs=pl.BlockSpec((TR, Dk), lambda i: (i, 0)),
        ),
        compiler_params=pltpu.CompilerParams(
            dimension_semantics=("parallel",),          # megacore-shards row tiles
            vmem_limit_bytes=48 * 1024 * 1024,          # above v5e's 16 MiB default,
        ),                                              # under v7x's 64 MiB physical
    )(*args)

    return out.reshape(orig_shape)


# ---------------------------------------------------------------------------
# Pure-JAX reference (mirrors the PyTorch module exactly)
# ---------------------------------------------------------------------------
def layer_norm_ref(x, gamma, beta, eps=EPS):
    d = x.shape[-1]
    mean = jnp.mean(x, axis=-1, keepdims=True)
    diff = x - mean
    std = jnp.sqrt(jnp.sum(diff * diff, axis=-1, keepdims=True) / (d - 1))
    return gamma * diff / (std + eps) + beta


# ---------------------------------------------------------------------------
if __name__ == "__main__":
    B, T, D = 2, 8, 32   # batch=2, seq=8, features=32

    key = jax.random.PRNGKey(0)
    kx, kg, kb = jax.random.split(key, 3)
    x = jax.random.normal(kx, (B, T, D), jnp.float32)
    # Non-trivial affine params to exercise the a_2 / b_2 path.
    gamma = 1.0 + 0.1 * jax.random.normal(kg, (D,), jnp.float32)
    beta = 0.1 * jax.random.normal(kb, (D,), jnp.float32)

    out = jax.block_until_ready(layer_norm(x, gamma, beta))
    ref = layer_norm_ref(x, gamma, beta)

    max_err = float(jnp.max(jnp.abs(out - ref)))
    assert np.allclose(np.asarray(out), np.asarray(ref), rtol=1e-3, atol=1e-3), \
        f"Pallas LayerNorm output does not match reference (max abs err {max_err:.3e})"

    print("KERNEL_OK")
</pallas_src>

<mosaic_0001>
module attributes {stable_mosaic.version = 11 : i64} {
  func.func @_ln_folded_kernel(%arg0: i32, %arg1: memref<4x128xf32, #tpu.memory_space<vmem>>, %arg2: memref<1x128xf32, #tpu.memory_space<vmem>>, %arg3: memref<1x128xf32, #tpu.memory_space<vmem>>, %arg4: memref<128x4xf32, #tpu.memory_space<vmem>>, %arg5: memref<4x128xf32, #tpu.memory_space<vmem>>) attributes {dimension_semantics = [#tpu.dimension_semantics<parallel>], iteration_bounds = array<i64: 1>, scalar_prefetch = 0 : i64, scratch_operands = 0 : i64, tpu.core_type = #tpu.core_type<tc>, window_params = [{transform_indices = @transform_0, window_bounds = array<i64: 4, 128>}, {pipeline_mode = #tpu.pipeline_mode<synchronous>, transform_indices = @transform_1, window_bounds = array<i64: 1, 128>}, {pipeline_mode = #tpu.pipeline_mode<synchronous>, transform_indices = @transform_2, window_bounds = array<i64: 1, 128>}, {pipeline_mode = #tpu.pipeline_mode<synchronous>, transform_indices = @transform_3, window_bounds = array<i64: 128, 4>}, {transform_indices = @transform_4, window_bounds = array<i64: 4, 128>}]} {
    %c0 = arith.constant 0 : index
    %c0_0 = arith.constant 0 : index
    %0 = vector.load %arg1[%c0, %c0_0] : memref<4x128xf32, #tpu.memory_space<vmem>>, vector<4x128xf32>
    %c0_1 = arith.constant 0 : index
    %c0_2 = arith.constant 0 : index
    %1 = vector.load %arg4[%c0_1, %c0_2] : memref<128x4xf32, #tpu.memory_space<vmem>>, vector<128x4xf32>
    %cst = arith.constant dense<0.000000e+00> : vector<4x4xf32>
    %2 = tpu.matmul %0, %1, %cst {dimension_numbers = #tpu.dot_dimension_numbers<[1], [0], [0], [1], [0, 0, 1, 1], [], []>, precision = #tpu.contract_precision<fp32>} : vector<4x128xf32>, vector<128x4xf32>, vector<4x4xf32> -> vector<4x4xf32>
    %3 = arith.mulf %0, %0 : vector<4x128xf32>
    %cst_3 = arith.constant dense<0.000000e+00> : vector<4x4xf32>
    %4 = tpu.matmul %3, %1, %cst_3 {dimension_numbers = #tpu.dot_dimension_numbers<[1], [0], [0], [1], [0, 0, 1, 1], [], []>, precision = #tpu.contract_precision<fp32>} : vector<4x128xf32>, vector<128x4xf32>, vector<4x4xf32> -> vector<4x4xf32>
    %cst_4 = arith.constant 3.125000e-02 : f32
    %5 = vector.broadcast %cst_4 : f32 to vector<4x4xf32>
    %6 = arith.mulf %2, %5 : vector<4x4xf32>
    %7 = arith.mulf %2, %6 : vector<4x4xf32>
    %8 = arith.subf %4, %7 : vector<4x4xf32>
    %cst_5 = arith.constant 0.0322580636 : f32
    %9 = vector.broadcast %cst_5 : f32 to vector<4x4xf32>
    %10 = arith.mulf %8, %9 : vector<4x4xf32>
    %cst_6 = arith.constant 0.000000e+00 : f32
    %11 = vector.broadcast %cst_6 : f32 to vector<4x4xf32>
    %12 = arith.maximumf %10, %11 : vector<4x4xf32>
    %13 = math.sqrt %12 : vector<4x4xf32>
    %cst_7 = arith.constant 9.99999997E-7 : f32
    %14 = vector.broadcast %cst_7 : f32 to vector<4x4xf32>
    %15 = arith.addf %13, %14 : vector<4x4xf32>
    %cst_8 = arith.constant 1.000000e+00 : f32
    %16 = vector.broadcast %cst_8 : f32 to vector<4x4xf32>
    %17 = arith.divf %16, %15 : vector<4x4xf32>
    %cst_9 = arith.constant dense<0.000000e+00> : vector<4x128xf32>
    %18 = tpu.matmul %6, %1, %cst_9 {dimension_numbers = #tpu.dot_dimension_numbers<[1], [1], [0], [0], [0, 0, 1, 0], [], []>, precision = #tpu.contract_precision<fp32>} : vector<4x4xf32>, vector<128x4xf32>, vector<4x128xf32> -> vector<4x128xf32>
    %cst_10 = arith.constant dense<0.000000e+00> : vector<4x128xf32>
    %19 = tpu.matmul %17, %1, %cst_10 {dimension_numbers = #tpu.dot_dimension_numbers<[1], [1], [0], [0], [0, 0, 1, 0], [], []>, precision = #tpu.contract_precision<fp32>} : vector<4x4xf32>, vector<128x4xf32>, vector<4x128xf32> -> vector<4x128xf32>
    %c0_11 = arith.constant 0 : index
    %c0_12 = arith.constant 0 : index
    %20 = vector.load %arg2[%c0_11, %c0_12] : memref<1x128xf32, #tpu.memory_space<vmem>>, vector<1x128xf32>
    %21 = arith.subf %0, %18 : vector<4x128xf32>
    %22 = arith.mulf %21, %19 : vector<4x128xf32>
    %23 = vector.broadcast %20 : vector<1x128xf32> to vector<4x128xf32>
    %24 = arith.mulf %23, %22 : vector<4x128xf32>
    %c0_13 = arith.constant 0 : index
    %c0_14 = arith.constant 0 : index
    %25 = vector.load %arg3[%c0_13, %c0_14] : memref<1x128xf32, #tpu.memory_space<vmem>>, vector<1x128xf32>
    %26 = vector.broadcast %25 : vector<1x128xf32> to vector<4x128xf32>
    %27 = arith.addf %24, %26 : vector<4x128xf32>
    %c0_15 = arith.constant 0 : index
    %c0_16 = arith.constant 0 : index
    %28 = vector.load %arg5[%c0_15, %c0_16] : memref<4x128xf32, #tpu.memory_space<vmem>>, vector<4x128xf32>
    tpu.vector_store %arg5[%c0_15, %c0_16], %27 {strides = array<i32>} : memref<4x128xf32, #tpu.memory_space<vmem>>, vector<4x128xf32>,
    return
  }
  func.func @transform_0(%arg0: i32) -> (i32, i32) {
    %c0_i32 = arith.constant 0 : i32
    %c0_i32_0 = arith.constant 0 : i32
    return %arg0, %c0_i32 : i32, i32
  }
  func.func @transform_1(%arg0: i32) -> (i32, i32) {
    %c0_i32 = arith.constant 0 : i32
    %c0_i32_0 = arith.constant 0 : i32
    %c0_i32_1 = arith.constant 0 : i32
    return %c0_i32, %c0_i32_0 : i32, i32
  }
  func.func @transform_2(%arg0: i32) -> (i32, i32) {
    %c0_i32 = arith.constant 0 : i32
    %c0_i32_0 = arith.constant 0 : i32
    %c0_i32_1 = arith.constant 0 : i32
    return %c0_i32, %c0_i32_0 : i32, i32
  }
  func.func @transform_3(%arg0: i32) -> (i32, i32) {
    %c0_i32 = arith.constant 0 : i32
    %c0_i32_0 = arith.constant 0 : i32
    %c0_i32_1 = arith.constant 0 : i32
    return %c0_i32, %c0_i32_0 : i32, i32
  }
  func.func @transform_4(%arg0: i32) -> (i32, i32) {
    %c0_i32 = arith.constant 0 : i32
    %c0_i32_0 = arith.constant 0 : i32
    return %arg0, %c0_i32 : i32, i32
  }
}

</mosaic_0001>

<bundles_post_ra>
// kernel: tpu_custom_call.1
= control target key start
LH: loop header
LB: loop body
LE: loop exit
PB: predicated region body
PF: predicated region fallthrough
CT: control target
= control target key end

     0   :  { %s2537_s0 = inlined_call_operand.vmem [shape: f32[4,128], index: 0, kind: input, shape index: {}]   ;;  %s2538_s1 = inlined_call_operand.vmem [shape: f32[1,128], index: 1, kind: input, shape index: {}]   ;;  %s2539_s2 = inlined_call_operand.vmem [shape: f32[1,128], index: 2, kind: input, shape index: {}]   ;;  %s2540_s3 = inlined_call_operand.vmem [shape: f32[128,4], index: 3, kind: input, shape index: {}]   ;;  %s2541_s4 = inlined_call_operand.hbm [shape: f32[4,128], index: 4, kind: output, shape index: {}]  }
   0x1   :  { %v1580_v0 = vld [vmem:[%s2540_s3 + $0x78] sm:$0xff]  ;;  %v1585_v1 = vld [vmem:[%s2540_s3 + $0x70] sm:$0xff]  ;;  %v1590_v2 = vld [vmem:[%s2540_s3 + $0x68] sm:$0xff] }
   0x2   :  { %2563 = vst [vmem:[#allocation5_spill] sm:$0xff] %v1585_v1  ;;  %v1593_v3 = vand.u32 4294901760, %v1580_v0  ;;  %v1596_v4 = vand.u32 4294901760, %v1585_v1  ;;  %v1599_v5 = vand.u32 4294901760, %v1590_v2  ;;  %v1604_v6 = vld [vmem:[%s2540_s3 + $0x60] sm:$0xff]  ;;  %v1609_v7 = vld [vmem:[%s2540_s3 + $0x58] sm:$0xff] }
   0x3   :  { %2564 = vst [vmem:[#allocation6_spill] sm:$0xff] %v1590_v2  ;;  %v1614_v8 = vld [vmem:[%s2540_s3 + $0x50] sm:$0xff]  ;;  %v1617_v9 = vand.u32 4294901760, %v1604_v6  ;;  %v1620_v10 = vand.u32 4294901760, %v1609_v7  ;;  %v1628_v12 = vld [vmem:[%s2540_s3 + $0x48] sm:$0xff]  ;;  %v1633_v13 = vld [vmem:[%s2540_s3 + $0x40] sm:$0xff] }
   0x4   :  { %2565 = vst [vmem:[#allocation7_spill] sm:$0xff] %v1604_v6  ;;  %v1623_v11 = vand.u32 4294901760, %v1614_v8  ;;  %36 = vmatpush.msra.mxu0 %v1593_v3  ;;  %v1638_v14 = vsub.f32 %v1580_v0, %v1593_v3  ;;  %v1642_v15 = vsub.f32 %v1585_v1, %v1596_v4  ;;  %232 = vmatpush.msra.mxu3 %v1593_v3  ;;  %v1650_v17 = vand.u32 4294901760, %v1628_v12  ;;  %v1670_v22 = vld [vmem:[%s2540_s3 + $0x38] sm:$0xff] }
   0x5   :  { %2566 = vst [vmem:[#allocation8_spill] sm:$0xff] %v1609_v7  ;;  %v1647_v16 = vsub.f32 %v1590_v2, %v1599_v5  ;;  %v1654_v18 = vsub.f32 %v1604_v6, %v1617_v9  ;;  %v1658_v19 = vsub.f32 %v1609_v7, %v1620_v10  ;;  %v1665_v21 = vand.u32 4294901760, %v1633_v13 }
   0x6   :  { %2567 = vst [vmem:[#allocation9_spill] sm:$0xff] %v1614_v8  ;;  %v1662_v20 = vsub.f32 %v1614_v8, %v1623_v11  ;;  %38 = vmatpush.msra.mxu0 %v1596_v4  ;;  %179 = vmatpush.msra.mxu2 %v1638_v14  ;;  %v1675_v23 = vand.u32 4294901760, %v1638_v14  ;;  %v1678_v24 = vand.u32 4294901760, %v1642_v15 }
   0x7   :  { %2568 = vst [vmem:[#allocation10_spill] sm:$0xff] %v1628_v12  ;;  %v1681_v25 = vand.u32 4294901760, %v1647_v16 }
   0x8   :  { %2569 = vst [vmem:[#allocation11_spill] sm:$0xff] %v1633_v13 }
   0x9   :  { %2570 = vst [vmem:[#allocation12_spill] sm:$0xff] %v1670_v22 }
   0xa   :  { %9 = vsyncpa [#allocation3], 0  ;;  %234 = vmatpush.msra.mxu3 %v1596_v4  ;;  %v1685_v26 = vand.u32 4294901760, %v1654_v18  ;;  %v1688_v27 = vand.u32 4294901760, %v1658_v19  ;;  %v1692_v28 = vsub.f32 %v1628_v12, %v1650_v17  ;;  %v1697_v29 = vld [vmem:[%s2540_s3 + $0x30] sm:$0xff]  ;;  %40 = vmatpush.msra.mxu0 %v1599_v5  ;;  %v79_v30 = vsub.f32 %v1638_v14, %v1675_v23  ;;  %v1721_v36 = vld [vmem:[%s2540_s3 + $0x28] sm:$0xff] }
   0xb   :  { %2571 = vst [vmem:[#allocation13_spill] sm:$0xff] %v1697_v29  ;;  %182 = vmatpush.msra.mxu2 %v1642_v15  ;;  %v85_v31 = vsub.f32 %v1642_v15, %v1678_v24  ;;  %v91_v32 = vsub.f32 %v1647_v16, %v1681_v25  ;;  %v1708_v33 = vand.u32 4294901760, %v1670_v22  ;;  %v1712_v34 = vand.u32 4294901760, %v1662_v20  ;;  %v1741_v42 = vld [vmem:[%s2540_s3 + $0x20] sm:$0xff]  ;;  %v1764_v48 = vld [vmem:[%s2540_s3 + $0x18] sm:$0xff]  ;;  %v1786_v54 = vld [vmem:[%s2540_s3 + $0x10] sm:$0xff] }
   0xc   :  { %236 = vmatpush.msra.mxu3 %v1599_v5  ;;  %v1716_v35 = vsub.f32 %v1633_v13, %v1665_v21  ;;  %2572 = vst [vmem:[#allocation14_spill] sm:$0xff] %v1721_v36  ;;  %42 = vmatpush.msra.mxu0 %v1617_v9  ;;  %v1724_v37 = vand.u32 4294901760, %v79_v30  ;;  %v97_v39 = vsub.f32 %v1654_v18, %v1685_v26  ;;  %v1732_v40 = vand.u32 4294901760, %v1697_v29  ;;  %v1809_v60 = vld [vmem:[%s2540_s3 + $0x8] sm:$0xff]  ;;  %s1551_s28 = smov [#allocation2]   ;;  %s1508_s6 = sshll.u32 %s2541_s4, 4  ;;  %s1509_s6 = int_to_ptr.hbm [resolvable:$true] %s1508_s6 }
   0xd   :  { %185 = vmatpush.msra.mxu2 %v1647_v16  ;;  %v1727_v38 = vand.u32 4294901760, %v85_v31  ;;  %v1736_v41 = vand.u32 4294901760, %v1692_v28  ;;  %2573 = vst [vmem:[#allocation15_spill] sm:$0xff] %v1741_v42  ;;  %v1745_v43 = vand.u32 4294901760, %v91_v32  ;;  %v103_v44 = vsub.f32 %v1658_v19, %v1688_v27  ;;  %v1832_v32 = vld [vmem:[%s2540_s3] sm:$0xff]  ;;  %s1506_s29 = sshll.u32 %s1551_s28, 4  ;;  %s1507_s29 = int_to_ptr.vmem [resolvable:$true] %s1506_s29 }
   0xe   :  { %238 = vmatpush.msra.mxu3 %v1617_v9  ;;  %81 = vmatpush.msra.mxu1 %v1724_v37  ;;  %v1751_v45 = vsub.f32 %v1670_v22, %v1708_v33  ;;  %v1754_v46 = vand.u32 4294901760, %v1721_v36  ;;  %v1759_v47 = vand.u32 4294901760, %v1716_v35  ;;  %2574 = vst [vmem:[#allocation16_spill] sm:$0xff] %v1764_v48  ;;  %v1768_v49 = vand.u32 4294901760, %v97_v39 }
   0xf   :  { %44 = vmatpush.msra.mxu0 %v1620_v10  ;;  %188 = vmatpush.msra.mxu2 %v1654_v18  ;;  %v109_v50 = vsub.f32 %v1662_v20, %v1712_v34  ;;  %v1774_v51 = vsub.f32 %v1697_v29, %v1732_v40  ;;  %v1777_v52 = vand.u32 4294901760, %v1741_v42  ;;  %v115_v53 = vsub.f32 %v1692_v28, %v1736_v41 }
  0x10   :  { %240 = vmatpush.msra.mxu3 %v1620_v10  ;;  %87 = vmatpush.msra.mxu1 %v1727_v38  ;;  %2575 = vst [vmem:[#allocation17_spill] sm:$0xff] %v1786_v54  ;;  %v1790_v55 = vand.u32 4294901760, %v103_v44  ;;  %v1793_v56 = vand.u32 4294901760, %v1751_v45  ;;  %v1797_v57 = vsub.f32 %v1721_v36, %v1754_v46  ;;  %v1800_v58 = vand.u32 4294901760, %v1764_v48 }
  0x11   :  { %46 = vmatpush.msra.mxu0 %v1623_v11  ;;  %191 = vmatpush.msra.mxu2 %v1658_v19  ;;  %v121_v59 = vsub.f32 %v1716_v35, %v1759_v47  ;;  %2577 = vst [vmem:[#allocation19_spill] sm:$0xff] %v1809_v60  ;;  %v1813_v61 = vand.u32 4294901760, %v109_v50  ;;  %v1816_v62 = vand.u32 4294901760, %v1774_v51  ;;  %v1820_v63 = vsub.f32 %v1741_v42, %v1777_v52 }
  0x12   :  { %242 = vmatpush.msra.mxu3 %v1623_v11  ;;  %93 = vmatpush.msra.mxu1 %v1745_v43  ;;  %2576 = vst [vmem:[#allocation18_spill] sm:$0xff] %v1797_v57  ;;  %v1823_v30 = vand.u32 4294901760, %v1786_v54  ;;  %v1826_v31 = vand.u32 4294901760, %v115_v53  ;;  %v127_v39 = vsub.f32 %v1751_v45, %v1793_v56  ;;  %v1839_v44 = vand.u32 4294901760, %v1797_v57 }
  0x13   :  { %48 = vmatpush.msra.mxu0 %v1650_v17  ;;  %194 = vmatpush.msra.mxu2 %v1662_v20  ;;  %2578 = vst [vmem:[#allocation20_spill] sm:$0xff] %v1820_v63  ;;  %v1843_v50 = vsub.f32 %v1764_v48, %v1800_v58  ;;  %v1846_v53 = vand.u32 4294901760, %v1809_v60  ;;  %v1849_v42 = vand.u32 4294901760, %v121_v59  ;;  %v133_v36 = vsub.f32 %v1774_v51, %v1816_v62 }
  0x14   :  { %244 = vmatpush.msra.mxu3 %v1650_v17  ;;  %99 = vmatpush.msra.mxu1 %v1768_v49  ;;  %2579 = vst [vmem:[#allocation21_spill] sm:$0xff] %v1832_v32  ;;  %v1857_v29 = vand.u32 4294901760, %v1820_v63  ;;  %v1861_v48 = vsub.f32 %v1786_v54, %v1823_v30  ;;  %v1864_v22 = vand.u32 4294901760, %v1832_v32  ;;  %v1870_v59 = vand.u32 4294901760, %v127_v39 }
  0x15   :  { %50 = vmatpush.msra.mxu0 %v1665_v21  ;;  %197 = vmatpush.msra.mxu2 %v1692_v28  ;;  %2580 = vst [vmem:[#allocation22_spill] sm:$0xff] %v1843_v50  ;;  %v139_v13 = vsub.f32 %v1797_v57, %v1839_v44  ;;  %v1875_v12 = vand.u32 4294901760, %v1843_v50  ;;  %v1879_v54 = vsub.f32 %v1809_v60, %v1846_v53  ;;  %v1885_v39 = vand.u32 4294901760, %v133_v36 }
  0x16   :  { %246 = vmatpush.msra.mxu3 %v1665_v21  ;;  %105 = vmatpush.msra.mxu1 %v1790_v55  ;;  %v145_v8 = vsub.f32 %v1820_v63, %v1857_v29  ;;  %v1890_v7 = vand.u32 4294901760, %v1861_v48  ;;  %v1894_v60 = vsub.f32 %v1832_v32, %v1864_v22  ;;  %vm751_vm0 = vcmask 31744  }
  0x17   :  { %52 = vmatpush.msra.mxu0 %v1708_v33  ;;  %200 = vmatpush.msra.mxu2 %v1716_v35  ;;  %v1900_v36 = vand.u32 4294901760, %v139_v13  ;;  %v151_v6 = vsub.f32 %v1843_v50, %v1875_v12  ;;  %v1905_v2 = vand.u32 4294901760, %v1879_v54 }
  0x18   :  { %248 = vmatpush.msra.mxu3 %v1708_v33  ;;  %111 = vmatpush.msra.mxu1 %v1813_v61  ;;  %v1911_v32 = vand.u32 4294901760, %v145_v8  ;;  %v157_v13 = vsub.f32 %v1861_v48, %v1890_v7  ;;  %v1916_v1 = vand.u32 4294901760, %v1894_v60 }
  0x19   :  { %54 = vmatpush.msra.mxu0 %v1732_v40  ;;  %203 = vmatpush.msra.mxu2 %v1751_v45  ;;  %v163_v8 = vsub.f32 %v1879_v54, %v1905_v2 }
  0x1a   :  { %250 = vmatpush.msra.mxu3 %v1732_v40  ;;  %117 = vmatpush.msra.mxu1 %v1826_v31 }
  0x1b   :  { %56 = vmatpush.msra.mxu0 %v1754_v46  ;;  %206 = vmatpush.msra.mxu2 %v1774_v51 }
  0x1c   :  { %252 = vmatpush.msra.mxu3 %v1754_v46  ;;  %123 = vmatpush.msra.mxu1 %v1849_v42 }
  0x1d   :  { %58 = vmatpush.msra.mxu0 %v1777_v52  ;;  %209 = vmatpush.msra.mxu2 %v1797_v57  ;;  %v169_v57 = vsub.f32 %v1894_v60, %v1916_v1 }
  0x1e   :  { %254 = vmatpush.msra.mxu3 %v1777_v52  ;;  %129 = vmatpush.msra.mxu1 %v1870_v59 }
  0x1f   :  { %60 = vmatpush.msra.mxu0 %v1800_v58  ;;  %212 = vmatpush.msra.mxu2 %v1820_v63  ;;  %v1922_v63 = vand.u32 4294901760, %v151_v6  ;;  %v1937_v6 = vand.u32 4294901760, %v163_v8  ;;  %v1955_v8 = vld [vmem:[%s2537_s0] sm:$0xf] }
  0x20   :  { %256 = vmatpush.msra.mxu3 %v1800_v58  ;;  %135 = vmatpush.msra.mxu1 %v1885_v39 }
  0x21   :  { %62 = vmatpush.msra.mxu0 %v1823_v30  ;;  %215 = vmatpush.msra.mxu2 %v1843_v50  ;;  %v1930_v50 = vand.u32 4294901760, %v157_v13  ;;  %v1944_v13 = vand.u32 4294901760, %v169_v57 }
  0x22   :  { %258 = vmatpush.msra.mxu3 %v1823_v30  ;;  %141 = vmatpush.msra.mxu1 %v1900_v36 }
  0x23   :  { %64 = vmatpush.msra.mxu0 %v1846_v53  ;;  %218 = vmatpush.msra.mxu2 %v1861_v48 }
  0x24   :  { %260 = vmatpush.msra.mxu3 %v1846_v53  ;;  %147 = vmatpush.msra.mxu1 %v1911_v32 }
  0x25   :  { %66 = vmatpush.msra.mxu0 %v1864_v22  ;;  %221 = vmatpush.msra.mxu2 %v1879_v54 }
  0x26   :  { %153 = vmatpush.msra.mxu1 %v1922_v63  ;;  %262 = vmatpush.msra.mxu3 %v1864_v22 }
  0x27   :  { %273 = vmatpush.msrb.mxu0 %v1675_v23  ;;  %224 = vmatpush.msra.mxu2 %v1894_v60 }
  0x28   :  { %159 = vmatpush.msra.mxu1 %v1930_v50  ;;  %423 = vmatpush.msrb.mxu3 %v1724_v37  ;;  %v1964_v37 = vand.u32 4294901760, %v1955_v8 }
  0x29   :  { %277 = vmatpush.msrb.mxu0 %v1678_v24  ;;  %378 = vmatpush.msrb.mxu2 %v1593_v3 }
  0x2a   :  { %165 = vmatpush.msra.mxu1 %v1937_v6  ;;  %429 = vmatpush.msrb.mxu3 %v1727_v38  ;;  %v68_v38 = vsub.f32 %v1955_v8, %v1964_v37 }
  0x2b   :  { %281 = vmatpush.msrb.mxu0 %v1681_v25  ;;  %380 = vmatpush.msrb.mxu2 %v1596_v4 }
  0x2c   :  { %171 = vmatpush.msra.mxu1 %v1944_v13  ;;  %435 = vmatpush.msrb.mxu3 %v1745_v43  ;;  %v69_v43 = vand.u32 4294901760, %v68_v38 }
  0x2d   :  { %285 = vmatpush.msrb.mxu0 %v1685_v26  ;;  %382 = vmatpush.msrb.mxu2 %v1599_v5 }
  0x2e   :  { %340 = vmatpush.msrb.mxu1 %v1593_v3  ;;  %441 = vmatpush.msrb.mxu3 %v1768_v49  ;;  %v70_v49 = vsub.f32 %v68_v38, %v69_v43 }
  0x2f   :  { %289 = vmatpush.msrb.mxu0 %v1688_v27  ;;  %384 = vmatpush.msrb.mxu2 %v1617_v9 }
  0x30   :  { %342 = vmatpush.msrb.mxu1 %v1596_v4  ;;  %447 = vmatpush.msrb.mxu3 %v1790_v55  ;;  %v376_v55 = vmul.f32 %v1955_v8, %v1955_v8 }
  0x31   :  { %293 = vmatpush.msrb.mxu0 %v1712_v34  ;;  %386 = vmatpush.msrb.mxu2 %v1620_v10 }
  0x32   :  { %344 = vmatpush.msrb.mxu1 %v1599_v5  ;;  %453 = vmatpush.msrb.mxu3 %v1813_v61 }
  0x33   :  { %297 = vmatpush.msrb.mxu0 %v1736_v41  ;;  %388 = vmatpush.msrb.mxu2 %v1623_v11 }
  0x34   :  { %346 = vmatpush.msrb.mxu1 %v1617_v9  ;;  %459 = vmatpush.msrb.mxu3 %v1826_v31 }
  0x35   :  { %301 = vmatpush.msrb.mxu0 %v1759_v47  ;;  %390 = vmatpush.msrb.mxu2 %v1650_v17 }
  0x36   :  { %348 = vmatpush.msrb.mxu1 %v1620_v10  ;;  %465 = vmatpush.msrb.mxu3 %v1849_v42  ;;  %v71_v42 = vand.u32 4294901760, %v70_v49 }
  0x37   :  { %305 = vmatpush.msrb.mxu0 %v1793_v56  ;;  %392 = vmatpush.msrb.mxu2 %v1665_v21 }
  0x38   :  { %350 = vmatpush.msrb.mxu1 %v1623_v11  ;;  %471 = vmatpush.msrb.mxu3 %v1870_v59 }
  0x39   :  { %309 = vmatpush.msrb.mxu0 %v1816_v62  ;;  %394 = vmatpush.msrb.mxu2 %v1708_v33 }
  0x3a   :  { %352 = vmatpush.msrb.mxu1 %v1650_v17  ;;  %477 = vmatpush.msrb.mxu3 %v1885_v39  ;;  %v2591_v39 = vld [vmem:[#allocation12_spill] sm:$0xff] }
  0x3b   :  { %313 = vmatpush.msrb.mxu0 %v1839_v44  ;;  %396 = vmatpush.msrb.mxu2 %v1732_v40 }
  0x3c   :  { %354 = vmatpush.msrb.mxu1 %v1665_v21  ;;  %483 = vmatpush.msrb.mxu3 %v1900_v36  ;;  %v777_v36 = vsel %vm751_vm0, %v2591_v39, 0 }
  0x3d   :  { %317 = vmatpush.msrb.mxu0 %v1857_v29  ;;  %398 = vmatpush.msrb.mxu2 %v1754_v46 }
  0x3e   :  { %356 = vmatpush.msrb.mxu1 %v1708_v33  ;;  %227 = vmatmul.f32.vlgmr.msra.gmra.mxu2 %v68_v38  ;;  %v2221_v38 = vand.u32 4294901760, %v777_v36 }
  0x3f   :  { %321 = vmatpush.msrb.mxu0 %v1875_v12  ;;  %400 = vmatpush.msrb.mxu2 %v1777_v52 }
  0x40   :  { %358 = vmatpush.msrb.mxu1 %v1732_v40  ;;  %489 = vmatpush.msrb.mxu3 %v1911_v32 }
  0x41   :  { %325 = vmatpush.msrb.mxu0 %v1890_v7  ;;  %402 = vmatpush.msrb.mxu2 %v1800_v58 }
  0x42   :  { %360 = vmatpush.msrb.mxu1 %v1754_v46  ;;  %72 = vmatmul.f32.vlgmr.msra.gmra.mxu0 %v71_v42 }
  0x43   :  { %266 = vmatmul.f32.vlgmr.msra.gmra.mxu3 %v69_v43  ;;  %329 = vmatpush.msrb.mxu0 %v1905_v2  ;;  %v2592_v43 = vld [vmem:[#allocation13_spill] sm:$0xff] }
  0x44   :  { %362 = vmatpush.msrb.mxu1 %v1777_v52  ;;  %404 = vmatpush.msrb.mxu2 %v1823_v30  ;;  %v774_v49 = vsel %vm751_vm0, %v2592_v43, 0  ;;  %v2599_v43 = vld [vmem:[#allocation19_spill] sm:$0xff] }
  0x45   :  { %495 = vmatpush.msrb.mxu3 %v1922_v63  ;;  %173 = vmatmul.f32.vlgmr.msra.gmra.mxu1 %v1964_v37 }
  0x46   :  { %333 = vmatpush.msrb.mxu0 %v1916_v1  ;;  %364 = vmatpush.msrb.mxu1 %v1800_v58 }
  0x47   :  { %406 = vmatpush.msrb.mxu2 %v1846_v53  ;;  %501 = vmatpush.msrb.mxu3 %v1930_v50 }
  0x48   :  { %521 = vmatpush.msra.mxu0 %v1638_v14  ;;  %366 = vmatpush.msrb.mxu1 %v1823_v30  ;;  %v2031_v14 = vand.u32 4294901760, %v376_v55 }
  0x49   :  { %408 = vmatpush.msrb.mxu2 %v1864_v22  ;;  %507 = vmatpush.msrb.mxu3 %v1937_v6 }
  0x4a   :  { %524 = vmatpush.msra.mxu0 %v1642_v15  ;;  %368 = vmatpush.msrb.mxu1 %v1846_v53  ;;  %v2042_v15 = vsub.f32 %v376_v55, %v2031_v14 }
  0x4b   :  { %615 = vmatpush.msra.mxu2 %v1675_v23  ;;  %513 = vmatpush.msrb.mxu3 %v1944_v13 }
  0x4c   :  { %335 = vmatmul.f32.vlgmr.msrb.gmra.mxu0 %v1964_v37  ;;  %370 = vmatpush.msrb.mxu1 %v1864_v22 }
  0x4d   :  { %527 = vmatpush.msra.mxu0 %v1647_v16  ;;  %619 = vmatpush.msra.mxu2 %v1678_v24  ;;  %v2583_v16 = vld [vmem:[#allocation20_spill] sm:$0xff] }
  0x4e   :  { %682 = vmatpush.msra.mxu3 %v1593_v3  ;;  %372 = vmatmul.f32.vlgmr.msrb.gmra.mxu1 %v1964_v37 }
  0x4f   :  { %530 = vmatpush.msra.mxu0 %v1654_v18  ;;  %574 = vmatpush.msra.mxu1 %v1593_v3  ;;  %v411_v3 = vand.u32 4294901760, %v2042_v15 }
  0x50   :  { %623 = vmatpush.msra.mxu2 %v1681_v25  ;;  %684 = vmatpush.msra.mxu3 %v1596_v4 }
  0x51   :  { %533 = vmatpush.msra.mxu0 %v1658_v19  ;;  %576 = vmatpush.msra.mxu1 %v1596_v4  ;;  %v801_v4 = vsel %vm751_vm0, %v1580_v0, 0  ;;  %v2584_v19 = vld [vmem:[#allocation22_spill] sm:$0xff] }
  0x52   :  { %627 = vmatpush.msra.mxu2 %v1685_v26  ;;  %686 = vmatpush.msra.mxu3 %v1599_v5 }
  0x53   :  { %536 = vmatpush.msra.mxu0 %v1662_v20  ;;  %578 = vmatpush.msra.mxu1 %v1599_v5  ;;  %v412_v5 = vsub.f32 %v2042_v15, %v411_v3 }
  0x54   :  { %631 = vmatpush.msra.mxu2 %v1688_v27  ;;  %688 = vmatpush.msra.mxu3 %v1617_v9  ;;  %v2586_v27 = vld [vmem:[#allocation7_spill] sm:$0xff] }
  0x55   :  { %539 = vmatpush.msra.mxu0 %v1692_v28  ;;  %580 = vmatpush.msra.mxu1 %v1617_v9  ;;  %v2581_v9 = vld [vmem:[#allocation18_spill] sm:$0xff]  ;;  %v792_v28 = vsel %vm751_vm0, %v2586_v27, 0 }
  0x56   :  { %635 = vmatpush.msra.mxu2 %v1712_v34  ;;  %690 = vmatpush.msra.mxu3 %v1620_v10  ;;  %v2122_v34 = vand.u32 4294901760, %v792_v28 }
  0x57   :  { %542 = vmatpush.msra.mxu0 %v1716_v35  ;;  %582 = vmatpush.msra.mxu1 %v1620_v10  ;;  %v2070_v10 = vand.u32 4294901760, %v801_v4 }
  0x58   :  { %639 = vmatpush.msra.mxu2 %v1736_v41  ;;  %692 = vmatpush.msra.mxu3 %v1623_v11 }
  0x59   :  { %545 = vmatpush.msra.mxu0 %v1751_v45  ;;  %584 = vmatpush.msra.mxu1 %v1623_v11  ;;  %v2582_v11 = vld [vmem:[#allocation5_spill] sm:$0xff]  ;;  %v2085_v20 = vsub.f32 %v801_v4, %v2070_v10  ;;  %v2593_v4 = vld [vmem:[#allocation14_spill] sm:$0xff] }
  0x5a   :  { %643 = vmatpush.msra.mxu2 %v1759_v47  ;;  %694 = vmatpush.msra.mxu3 %v1650_v17  ;;  %v798_v0 = vsel %vm751_vm0, %v2582_v11, 0 }
  0x5b   :  { %548 = vmatpush.msra.mxu0 %v1774_v51  ;;  %586 = vmatpush.msra.mxu1 %v1650_v17  ;;  %v413_v17 = vand.u32 4294901760, %v412_v5  ;;  %v2080_v18 = vand.u32 4294901760, %v798_v0  ;;  %v2102_v26 = vand.u32 4294901760, %v2085_v20  ;;  %v771_v5 = vsel %vm751_vm0, %v2593_v4, 0 }
  0x5c   :  { %647 = vmatpush.msra.mxu2 %v1793_v56  ;;  %696 = vmatpush.msra.mxu3 %v1665_v21  ;;  %v2589_v56 = vld [vmem:[#allocation10_spill] sm:$0xff] }
  0x5d   :  { %551 = vmatpush.msra.mxu0 %v2581_v9  ;;  %588 = vmatpush.msra.mxu1 %v1665_v21  ;;  %v2585_v21 = vld [vmem:[#allocation6_spill] sm:$0xff]  ;;  %v2097_v25 = vsub.f32 %v798_v0, %v2080_v18  ;;  %v783_v57 = vsel %vm751_vm0, %v2589_v56, 0 }
  0x5e   :  { %651 = vmatpush.msra.mxu2 %v1816_v62  ;;  %698 = vmatpush.msra.mxu3 %v1708_v33  ;;  %v795_v23 = vsel %vm751_vm0, %v2585_v21, 0 }
  0x5f   :  { %554 = vmatpush.msra.mxu0 %v2583_v16  ;;  %590 = vmatpush.msra.mxu1 %v1708_v33  ;;  %v2094_v24 = vand.u32 4294901760, %v795_v23  ;;  %v847_v33 = vsub.f32 %v2085_v20, %v2102_v26  ;;  %v2254_v16 = vand.u32 4294901760, %v771_v5 }
  0x60   :  { %655 = vmatpush.msra.mxu2 %v1839_v44  ;;  %700 = vmatpush.msra.mxu3 %v1732_v40 }
  0x61   :  { %557 = vmatpush.msra.mxu0 %v2584_v19  ;;  %592 = vmatpush.msra.mxu1 %v1732_v40  ;;  %v2139_v41 = vand.u32 4294901760, %v847_v33  ;;  %v2594_v19 = vld [vmem:[#allocation15_spill] sm:$0xff] }
  0x62   :  { %659 = vmatpush.msra.mxu2 %v1857_v29  ;;  %702 = vmatpush.msra.mxu3 %v1754_v46  ;;  %v2116_v29 = vsub.f32 %v795_v23, %v2094_v24  ;;  %v768_v21 = vsel %vm751_vm0, %v2594_v19, 0 }
  0x63   :  { %414 = vmatmul.f32.vlgmr.msrb.gmra.mxu2 %v413_v17  ;;  %515 = vmatmul.f32.vlgmr.msrb.gmra.mxu3 %v2031_v14  ;;  %v2263_v23 = vand.u32 4294901760, %v768_v21 }
  0x64   :  { %560 = vmatpush.msra.mxu0 %v1861_v48  ;;  %594 = vmatpush.msra.mxu1 %v1754_v46  ;;  %v2135_v40 = vand.u32 4294901760, %v2116_v29  ;;  %v2588_v46 = vld [vmem:[#allocation9_spill] sm:$0xff] }
  0x65   :  { %663 = vmatpush.msra.mxu2 %v1875_v12  ;;  %704 = vmatpush.msra.mxu3 %v1777_v52  ;;  %v2113_v12 = vand.u32 4294901760, %v2097_v25  ;;  %v786_v47 = vsel %vm751_vm0, %v2588_v46, 0  ;;  %v2282_v46 = vsub.f32 %v768_v21, %v2263_v23  ;;  %v2600_v21 = vld [vmem:[#allocation21_spill] sm:$0xff] }
  0x66   :  { %563 = vmatpush.msra.mxu0 %v1879_v54  ;;  %596 = vmatpush.msra.mxu1 %v1777_v52  ;;  %v859_v51 = vsub.f32 %v2116_v29, %v2135_v40  ;;  %v2164_v54 = vand.u32 4294901760, %v786_v47 }
  0x67   :  { %667 = vmatpush.msra.mxu2 %v1890_v7  ;;  %706 = vmatpush.msra.mxu3 %v1800_v58  ;;  %v2587_v7 = vld [vmem:[#allocation8_spill] sm:$0xff] }
  0x68   :  { %566 = vmatpush.msra.mxu0 %v1894_v60  ;;  %598 = vmatpush.msra.mxu1 %v1800_v58  ;;  %v789_v35 = vsel %vm751_vm0, %v2587_v7, 0  ;;  %v2172_v58 = vand.u32 4294901760, %v859_v51  ;;  %v2175_v60 = vand.u32 4294901760, %v783_v57  ;;  %v2185_v63 = vsub.f32 %v786_v47, %v2164_v54 }
  0x69   :  { %671 = vmatpush.msra.mxu2 %v1905_v2  ;;  %708 = vmatpush.msra.mxu3 %v1823_v30  ;;  %v853_v2 = vsub.f32 %v2097_v25, %v2113_v12  ;;  %v2141_v45 = vand.u32 4294901760, %v789_v35  ;;  %v2275_v7 = vsub.f32 %v771_v5, %v2254_v16 }
  0x6a   :  { %804 = vmatpush.xpose.msrb.mxu0 %v2070_v10  ;;  %600 = vmatpush.msra.mxu1 %v1823_v30  ;;  %v2590_v30 = vld [vmem:[#allocation11_spill] sm:$0xff]  ;;  %v2194_v44 = vsub.f32 %v783_v57, %v2175_v60  ;;  %v2202_v59 = vand.u32 4294901760, %v2185_v63 }
  0x6b   :  { %675 = vmatpush.msra.mxu2 %v1916_v1  ;;  %710 = vmatpush.msra.mxu3 %v1846_v53  ;;  %v2144_v1 = vsub.f32 %v792_v28, %v2122_v34  ;;  %v2154_v48 = vand.u32 4294901760, %v853_v2  ;;  %v780_v31 = vsel %vm751_vm0, %v2590_v30, 0  ;;  %2595 = vst [vmem:[#allocation18_spill] sm:$0xff] %v2275_v7  ;;  %v2290_v56 = vand.u32 4294901760, %v2275_v7 }
  0x6c   :  { %569 = vmatmul.f32.vlgmr.msra.gmra.mxu0 %v2042_v15  ;;  %677 = vmatmul.f32.vlgmr.msra.gmra.mxu2 %v2031_v14  ;;  %v2191_v32 = vand.u32 4294901760, %v780_v31  ;;  %v2210_v6 = vand.u32 4294901760, %v2194_v44  ;;  %v877_v37 = vsub.f32 %v2185_v63, %v2202_v59  ;;  %v2236_v15 = vand.u32 4294901760, %v774_v49 }
  0x6d   :  { %602 = vmatpush.msra.mxu1 %v1846_v53  ;;  %712 = vmatpush.msra.mxu3 %v1864_v22  ;;  %v2161_v52 = vand.u32 4294901760, %v2144_v1  ;;  %v907_v39 = vsub.f32 %v2275_v7, %v2290_v56 }
  0x6e   :  { %806 = vmatpush.xpose.msrb.mxu0 %v2080_v18  ;;  %714 = vmatmul.f32.vlgmr.msra.gmra.mxu3 %v2031_v14  ;;  %v2213_v13 = vsub.f32 %v780_v31, %v2191_v32  ;;  %v883_v42 = vsub.f32 %v2194_v44, %v2210_v6  ;;  %v2233_v14 = vand.u32 4294901760, %v877_v37  ;;  %v2257_v17 = vsub.f32 %v774_v49, %v2236_v15 }
  0x6f   :  { %604 = vmatpush.msra.mxu1 %v1864_v22  ;;  %1000 = vmatpush.xpose.msrb.mxu3 %v2070_v10  ;;  %v2167_v22 = vsub.f32 %v789_v35, %v2141_v45  ;;  %v865_v61 = vsub.f32 %v2144_v1, %v2161_v52  ;;  %v2596_v35 = vld [vmem:[#allocation16_spill] sm:$0xff]  ;;  %v2300_v31 = vand.u32 4294901760, %v2282_v46  ;;  %v759_v49 = vsel %vm751_vm0, %v2599_v43, 0 }
  0x70   :  { %608 = vmatmul.f32.vlgmr.msra.gmra.mxu1 %v411_v3  ;;  %947 = vmatpush.xpose.msrb.mxu2 %v2085_v20  ;;  %v2230_v55 = vand.u32 4294901760, %v2213_v13  ;;  %v2239_v3 = vsub.f32 %v777_v36, %v2221_v38  ;;  %v2244_v9 = vand.u32 4294901760, %v883_v42  ;;  %v2271_v33 = vand.u32 4294901760, %v2257_v17 }
  0x71   :  { %849 = vmatpush.xpose.msrb.mxu1 %v2139_v41  ;;  %v2181_v62 = vand.u32 4294901760, %v2167_v22  ;;  %v2197_v50 = vand.u32 4294901760, %v865_v61  ;;  %v765_v2 = vsel %vm751_vm0, %v2596_v35, 0  ;;  %v2597_v61 = vld [vmem:[#allocation17_spill] sm:$0xff]  ;;  %v913_v42 = vsub.f32 %v2282_v46, %v2300_v31 }
  0x72   :  { %808 = vmatpush.xpose.msrb.mxu0 %v2094_v24  ;;  %v889_v11 = vsub.f32 %v2213_v13, %v2230_v55  ;;  %v2251_v0 = vand.u32 4294901760, %v2239_v3  ;;  %v901_v51 = vsub.f32 %v2257_v17, %v2271_v33  ;;  %v2293_v57 = vand.u32 4294901760, %v765_v2 }
  0x73   :  { %1002 = vmatpush.xpose.msrb.mxu3 %v2080_v18  ;;  %v871_v53 = vsub.f32 %v2167_v22, %v2181_v62  ;;  %v762_v30 = vsel %vm751_vm0, %v2597_v61, 0  ;;  %v2320_v4 = vand.u32 4294901760, %v907_v39  ;;  %v2334_v35 = vand.u32 4294901760, %v913_v42 }
  0x74   :  { %950 = vmatpush.xpose.msrb.mxu2 %v2097_v25  ;;  %v2266_v27 = vand.u32 4294901760, %v889_v11  ;;  %v895_v28 = vsub.f32 %v2239_v3, %v2251_v0  ;;  %v2308_v36 = vand.u32 4294901760, %v762_v30  ;;  %v2311_v37 = vsub.f32 %v765_v2, %v2293_v57 }
  0x75   :  { %855 = vmatpush.xpose.msrb.mxu1 %v2154_v48  ;;  %v2216_v8 = vand.u32 4294901760, %v871_v53  ;;  %v2303_v53 = vand.u32 4294901760, %v901_v51  ;;  %v2326_v11 = vand.u32 4294901760, %v759_v49 }
  0x76   :  { %810 = vmatpush.xpose.msrb.mxu0 %v2122_v34  ;;  %v2285_v47 = vand.u32 4294901760, %v895_v28  ;;  %2598 = vst [vmem:[#allocation5_spill] sm:$0xff] %v2311_v37  ;;  %v2323_v5 = vand.u32 4294901760, %v2311_v37  ;;  %v2329_v19 = vsub.f32 %v762_v30, %v2308_v36  ;;  %v756_v28 = vsel %vm751_vm0, %v2600_v21, 0 }
  0x77   :  { %1004 = vmatpush.xpose.msrb.mxu3 %v2094_v24  ;;  %v2344_v61 = vand.u32 4294901760, %v756_v28  ;;  %v2347_v30 = vsub.f32 %v759_v49, %v2326_v11 }
  0x78   :  { %953 = vmatpush.xpose.msrb.mxu2 %v2116_v29  ;;  %v919_v2 = vsub.f32 %v2311_v37, %v2323_v5  ;;  %v2341_v51 = vand.u32 4294901760, %v2329_v19 }
  0x79   :  { %861 = vmatpush.xpose.msrb.mxu1 %v2172_v58  ;;  %v2357_v42 = vand.u32 4294901760, %v2347_v30  ;;  %v2361_v21 = vsub.f32 %v756_v28, %v2344_v61 }
  0x7a   :  { %812 = vmatpush.xpose.msrb.mxu0 %v2141_v45  ;;  %v2352_v39 = vand.u32 4294901760, %v919_v2  ;;  %v925_v43 = vsub.f32 %v2329_v19, %v2341_v51 }
  0x7b   :  { %1006 = vmatpush.xpose.msrb.mxu3 %v2122_v34  ;;  %2601 = vst [vmem:[#allocation20_spill] sm:$0xff] %v2361_v21  ;;  %v931_v2 = vsub.f32 %v2347_v30, %v2357_v42 }
  0x7c   :  { %956 = vmatpush.xpose.msrb.mxu2 %v2144_v1  ;;  %v2366_v49 = vand.u32 4294901760, %v925_v43 }
  0x7d   :  { %867 = vmatpush.xpose.msrb.mxu1 %v2197_v50  ;;  %v2377_v28 = vand.u32 4294901760, %v931_v2 }
  0x7e   :  { %814 = vmatpush.xpose.msrb.mxu0 %v2164_v54 }
  0x7f   :  { %1008 = vmatpush.xpose.msrb.mxu3 %v2141_v45 }
  0x80   :  { %959 = vmatpush.xpose.msrb.mxu2 %v2167_v22 }
  0x81   :  { %873 = vmatpush.xpose.msrb.mxu1 %v2216_v8 }
  0x82   :  { %816 = vmatpush.xpose.msrb.mxu0 %v2175_v60 }
  0x83   :  { %1010 = vmatpush.xpose.msrb.mxu3 %v2164_v54 }
  0x84   :  { %962 = vmatpush.xpose.msrb.mxu2 %v2185_v63 }
  0x85   :  { %879 = vmatpush.xpose.msrb.mxu1 %v2233_v14 }
  0x86   :  { %818 = vmatpush.xpose.msrb.mxu0 %v2191_v32 }
  0x87   :  { %1012 = vmatpush.xpose.msrb.mxu3 %v2175_v60 }
  0x88   :  { %965 = vmatpush.xpose.msrb.mxu2 %v2194_v44 }
  0x89   :  { %885 = vmatpush.xpose.msrb.mxu1 %v2244_v9 }
  0x8a   :  { %820 = vmatpush.xpose.msrb.mxu0 %v2221_v38 }
  0x8b   :  { %1014 = vmatpush.xpose.msrb.mxu3 %v2191_v32 }
  0x8c   :  { %968 = vmatpush.xpose.msrb.mxu2 %v2213_v13 }
  0x8d   :  { %891 = vmatpush.xpose.msrb.mxu1 %v2266_v27 }
  0x8e   :  { %822 = vmatpush.xpose.msrb.mxu0 %v2236_v15 }
  0x8f   :  { %1016 = vmatpush.xpose.msrb.mxu3 %v2221_v38 }
  0x90   :  { %971 = vmatpush.xpose.msrb.mxu2 %v2239_v3 }
  0x91   :  { %897 = vmatpush.xpose.msrb.mxu1 %v2285_v47 }
  0x92   :  { %824 = vmatpush.xpose.msrb.mxu0 %v2254_v16 }
  0x93   :  { %1018 = vmatpush.xpose.msrb.mxu3 %v2236_v15 }
  0x94   :  { %974 = vmatpush.xpose.msrb.mxu2 %v2257_v17 }
  0x95   :  { %903 = vmatpush.xpose.msrb.mxu1 %v2303_v53 }
  0x96   :  { %826 = vmatpush.xpose.msrb.mxu0 %v2263_v23 }
  0x97   :  { %1020 = vmatpush.xpose.msrb.mxu3 %v2254_v16 }
  0x98   :  { %977 = vmatpush.xpose.msrb.mxu2 %v2275_v7  ;;  %v2371_v7 = vand.u32 4294901760, %v2361_v21 }
  0x99   :  { %909 = vmatpush.xpose.msrb.mxu1 %v2320_v4 }
  0x9a   :  { %828 = vmatpush.xpose.msrb.mxu0 %v2293_v57  ;;  %v937_v43 = vsub.f32 %v2361_v21, %v2371_v7 }
  0x9b   :  { %1022 = vmatpush.xpose.msrb.mxu3 %v2263_v23 }
  0x9c   :  { %980 = vmatpush.xpose.msrb.mxu2 %v2282_v46 }
  0x9d   :  { %915 = vmatpush.xpose.msrb.mxu1 %v2334_v35 }
  0x9e   :  { %830 = vmatpush.xpose.msrb.mxu0 %v2308_v36 }
  0x9f   :  { %1024 = vmatpush.xpose.msrb.mxu3 %v2293_v57 }
  0xa0   :  { %983 = vmatpush.xpose.msrb.mxu2 %v2311_v37  ;;  %v2386_v37 = vand.u32 4294901760, %v937_v43 }
  0xa1   :  { %921 = vmatpush.xpose.msrb.mxu1 %v2352_v39 }
  0xa2   :  { %832 = vmatpush.xpose.msrb.mxu0 %v2326_v11 }
  0xa3   :  { %1026 = vmatpush.xpose.msrb.mxu3 %v2308_v36 }
  0xa4   :  { %986 = vmatpush.xpose.msrb.mxu2 %v2329_v19 }
  0xa5   :  { %927 = vmatpush.xpose.msrb.mxu1 %v2366_v49 }
  0xa6   :  { %834 = vmatpush.xpose.msrb.mxu0 %v2344_v61 }
  0xa7   :  { %1028 = vmatpush.xpose.msrb.mxu3 %v2326_v11 }
  0xa8   :  { %989 = vmatpush.xpose.msrb.mxu2 %v2347_v30 }
  0xa9   :  { %933 = vmatpush.xpose.msrb.mxu1 %v2377_v28 }
  0xaa   :  { %1041 = vmatpush.xpose.msra.mxu0 %v2102_v26 }
  0xab   :  { %1030 = vmatpush.xpose.msrb.mxu3 %v2344_v61 }
  0xac   :  { %992 = vmatpush.xpose.msrb.mxu2 %v2361_v21 }
  0xad   :  { %939 = vmatpush.xpose.msrb.mxu1 %v2386_v37 }
  0xae   :  { %1045 = vmatpush.xpose.msra.mxu0 %v2113_v12 }
  0xaf   :  { %1193 = vmatpush.xpose.msra.mxu3 %v2139_v41 }
  0xb0   :  { %1148 = vmatpush.xpose.msra.mxu2 %v2070_v10 }
  0xb1   :  { %1108 = vmatpush.xpose.msra.mxu1 %v2070_v10 }
  0xb2   :  { %1049 = vmatpush.xpose.msra.mxu0 %v2135_v40 }
  0xb3   :  { %1199 = vmatpush.xpose.msra.mxu3 %v2154_v48 }
  0xb4   :  { %1150 = vmatpush.xpose.msra.mxu2 %v2080_v18 }
  0xb5   :  { %1110 = vmatpush.xpose.msra.mxu1 %v2080_v18 }
  0xb6   :  { %1053 = vmatpush.xpose.msra.mxu0 %v2161_v52 }
  0xb7   :  { %1205 = vmatpush.xpose.msra.mxu3 %v2172_v58 }
  0xb8   :  { %1152 = vmatpush.xpose.msra.mxu2 %v2094_v24 }
  0xb9   :  { %1112 = vmatpush.xpose.msra.mxu1 %v2094_v24 }
  0xba   :  { %1057 = vmatpush.xpose.msra.mxu0 %v2181_v62 }
  0xbb   :  { %1211 = vmatpush.xpose.msra.mxu3 %v2197_v50 }
  0xbc   :  { %1154 = vmatpush.xpose.msra.mxu2 %v2122_v34 }
  0xbd   :  { %1114 = vmatpush.xpose.msra.mxu1 %v2122_v34 }
  0xbe   :  { %1061 = vmatpush.xpose.msra.mxu0 %v2202_v59 }
  0xbf   :  { %1217 = vmatpush.xpose.msra.mxu3 %v2216_v8  ;;  %v73_v41 = vpop.f32.mrf.mxu0 }
  0xc0   :  { %1156 = vmatpush.xpose.msra.mxu2 %v2141_v45 }
  0xc1   :  { %1116 = vmatpush.xpose.msra.mxu1 %v2141_v45  ;;  %v228_v58 = vpop.f32.mrf.mxu2 }
  0xc2   :  { %1065 = vmatpush.xpose.msra.mxu0 %v2210_v6  ;;  %v174_v48 = vpop.f32.mrf.mxu1 }
  0xc3   :  { %1223 = vmatpush.xpose.msra.mxu3 %v2233_v14  ;;  %v175_v50 = vadd.f32 %v174_v48, %v73_v41 }
  0xc4   :  { %1158 = vmatpush.xpose.msra.mxu2 %v2164_v54 }
  0xc5   :  { %1118 = vmatpush.xpose.msra.mxu1 %v2164_v54  ;;  %v229_v8 = vadd.f32 %v228_v58, %v175_v50 }
  0xc6   :  { %1069 = vmatpush.xpose.msra.mxu0 %v2230_v55  ;;  %v267_v2 = vpop.f32.mrf.mxu3 }
  0xc7   :  { %1229 = vmatpush.xpose.msra.mxu3 %v2244_v9  ;;  %v268_v14 = vadd.f32 %v267_v2, %v229_v8 }
  0xc8   :  { %1160 = vmatpush.xpose.msra.mxu2 %v2175_v60 }
  0xc9   :  { %1120 = vmatpush.xpose.msra.mxu1 %v2175_v60  ;;  %v336_v43 = vpop.f32.mrf.mxu0 }
  0xca   :  { %1073 = vmatpush.xpose.msra.mxu0 %v2251_v0  ;;  %v337_v21 = vadd.f32 %v336_v43, %v268_v14 }
  0xcb   :  { %1235 = vmatpush.xpose.msra.mxu3 %v2266_v27  ;;  %v373_v9 = vpop.f32.mrf.mxu1 }
  0xcc   :  { %1162 = vmatpush.xpose.msra.mxu2 %v2191_v32  ;;  %v2425_v41 = vadd.f32 %v373_v9, %v337_v21 }
  0xcd   :  { %1122 = vmatpush.xpose.msra.mxu1 %v2191_v32 }
  0xce   :  { %1077 = vmatpush.xpose.msra.mxu0 %v2271_v33  ;;  %v718_v48 = vmul.f32 0.03125, %v2425_v41 }
  0xcf   :  { %1241 = vmatpush.xpose.msra.mxu3 %v2285_v47 }
  0xd0   :  { %1164 = vmatpush.xpose.msra.mxu2 %v2221_v38  ;;  %v753_v27 = vsel %vm751_vm0, %v718_v48, 0 }
  0xd1   :  { %1124 = vmatpush.xpose.msra.mxu1 %v2221_v38  ;;  %v835_v58 = vand.u32 4294901760, %v753_v27 }
  0xd2   :  { %1081 = vmatpush.xpose.msra.mxu0 %v2290_v56 }
  0xd3   :  { %1247 = vmatpush.xpose.msra.mxu3 %v2303_v53  ;;  %v836_v47 = vsub.f32 %v753_v27, %v835_v58  ;;  %941 = vmatmul.f32.vlgmr.msrb.gmra.mxu1 %v835_v58 }
  0xd4   :  { %1166 = vmatpush.xpose.msra.mxu2 %v2236_v15 }
  0xd5   :  { %1126 = vmatpush.xpose.msra.mxu1 %v2236_v15  ;;  %995 = vmatmul.f32.vlgmr.msrb.gmra.mxu2 %v836_v47  ;;  %v837_v21 = vand.u32 4294901760, %v836_v47 }
  0xd6   :  { %1085 = vmatpush.xpose.msra.mxu0 %v2300_v31 }
  0xd7   :  { %1253 = vmatpush.xpose.msra.mxu3 %v2320_v4  ;;  %v838_v53 = vsub.f32 %v836_v47, %v837_v21 }
  0xd8   :  { %1168 = vmatpush.xpose.msra.mxu2 %v2254_v16  ;;  %1034 = vmatmul.f32.vlgmr.msrb.gmra.mxu3 %v837_v21 }
  0xd9   :  { %1128 = vmatpush.xpose.msra.mxu1 %v2254_v16  ;;  %v839_v50 = vand.u32 4294901760, %v838_v53 }
  0xda   :  { %1089 = vmatpush.xpose.msra.mxu0 %v2323_v5 }
  0xdb   :  { %1259 = vmatpush.xpose.msra.mxu3 %v2334_v35  ;;  %840 = vmatmul.f32.vlgmr.msrb.gmra.mxu0 %v839_v50 }
  0xdc   :  { %1170 = vmatpush.xpose.msra.mxu2 %v2263_v23 }
  0xdd   :  { %1130 = vmatpush.xpose.msra.mxu1 %v2263_v23 }
  0xde   :  { %1093 = vmatpush.xpose.msra.mxu0 %v2341_v51 }
  0xdf   :  { %1265 = vmatpush.xpose.msra.mxu3 %v2352_v39 }
  0xe0   :  { %1172 = vmatpush.xpose.msra.mxu2 %v2293_v57 }
  0xe1   :  { %1132 = vmatpush.xpose.msra.mxu1 %v2293_v57 }
  0xe2   :  { %1097 = vmatpush.xpose.msra.mxu0 %v2357_v42 }
  0xe3   :  { %1271 = vmatpush.xpose.msra.mxu3 %v2366_v49 }
  0xe4   :  { %1174 = vmatpush.xpose.msra.mxu2 %v2308_v36 }
  0xe5   :  { %1134 = vmatpush.xpose.msra.mxu1 %v2308_v36 }
  0xe6   :  { %1101 = vmatpush.xpose.msra.mxu0 %v2371_v7  ;;  %v415_v4 = vpop.f32.mrf.mxu2  ;;  %v516_v35 = vpop.f32.mrf.mxu3 }
  0xe7   :  { %1277 = vmatpush.xpose.msra.mxu3 %v2377_v28  ;;  %v517_v39 = vadd.f32 %v516_v35, %v415_v4 }
  0xe8   :  { %1176 = vmatpush.xpose.msra.mxu2 %v2326_v11 }
  0xe9   :  { %1136 = vmatpush.xpose.msra.mxu1 %v2326_v11  ;;  %1103 = vmatmul.f32.vlgmr.msra.gmra.mxu0 %v835_v58  ;;  %v570_v49 = vpop.f32.mrf.mxu0 }
  0xea   :  { %1291 = vmatpush.xpose.msrb.mxu0 %v2085_v20  ;;  %v571_v20 = vadd.f32 %v570_v49, %v517_v39  ;;  %v1524_v39 = vld [vmem:[%s2537_s0] sm:$0xf] }
  0xeb   :  { %1283 = vmatpush.xpose.msra.mxu3 %v2386_v37 }
  0xec   :  { %1178 = vmatpush.xpose.msra.mxu2 %v2344_v61 }
  0xed   :  { %1138 = vmatpush.xpose.msra.mxu1 %v2344_v61  ;;  %v609_v28 = vpop.f32.mrf.mxu1 }
  0xee   :  { %1294 = vmatpush.xpose.msrb.mxu0 %v2097_v25  ;;  %v610_v8 = vadd.f32 %v609_v28, %v571_v20  ;;  %v1518_v28 = vld [vmem:[%s2538_s1] ss:$0 sm:$0xff] }
  0xef   :  { %1452 = vmatpush.xpose.msrb.mxu3 %v2070_v10  ;;  %v678_v25 = vpop.f32.mrf.mxu2 }
  0xf0   :  { %1385 = vmatpush.xpose.msrb.mxu2 %v2102_v26  ;;  %1140 = vmatmul.f32.vlgmr.msra.gmra.mxu1 %v835_v58 }
  0xf1   :  { %1344 = vmatpush.xpose.msrb.mxu1 %v2070_v10  ;;  %v679_v10 = vadd.f32 %v678_v25, %v610_v8  ;;  %v715_v37 = vpop.f32.mrf.mxu3  ;;  %v1519_v25 = vld [vmem:[%s2539_s2] ss:$0 sm:$0xff] }
  0xf2   :  { %1297 = vmatpush.xpose.msrb.mxu0 %v2116_v29  ;;  %v719_v29 = vmul.f32 %v718_v48, %v2425_v41 }
  0xf3   :  { %1454 = vmatpush.xpose.msrb.mxu3 %v2080_v18  ;;  %v716_v2 = vadd.f32 %v715_v37, %v679_v10 }
  0xf4   :  { %1389 = vmatpush.xpose.msrb.mxu2 %v2113_v12 }
  0xf5   :  { %1346 = vmatpush.xpose.msrb.mxu1 %v2080_v18  ;;  %v720_v26 = vsub.f32 %v716_v2, %v719_v29 }
  0xf6   :  { %1300 = vmatpush.xpose.msrb.mxu0 %v2144_v1 }
  0xf7   :  { %1456 = vmatpush.xpose.msrb.mxu3 %v2094_v24  ;;  %v721_v18 = vmul.f32 0.032258064, %v720_v26 }
  0xf8   :  { %1393 = vmatpush.xpose.msrb.mxu2 %v2135_v40 }
  0xf9   :  { %1348 = vmatpush.xpose.msrb.mxu1 %v2094_v24  ;;  %v722_v12 = vmax.f32 %v721_v18, 0.0 }
  0xfa   :  { %1303 = vmatpush.xpose.msrb.mxu0 %v2167_v22  ;;  %v2602_v22 = vld [vmem:[#allocation18_spill] sm:$0xff] }
  0xfb   :  { %1458 = vmatpush.xpose.msrb.mxu3 %v2122_v34  ;;  %1520 = vrsqrt.f32 %v722_v12  ;;  %vm730_vm1 = vcmp.eq.f32.partialorder %v722_v12, inf  ;;  %vm732_vm2 = vcmp.eq.f32.partialorder %v722_v12, 0.0 }
  0xfc   :  { %1397 = vmatpush.xpose.msrb.mxu2 %v2161_v52 }
  0xfd   :  { %1350 = vmatpush.xpose.msrb.mxu1 %v2122_v34 }
  0xfe   :  { %1306 = vmatpush.xpose.msrb.mxu0 %v2185_v63 }
  0xff   :  { %1460 = vmatpush.xpose.msrb.mxu3 %v2141_v45 }
 0x100   :  { %1401 = vmatpush.xpose.msrb.mxu2 %v2181_v62 }
 0x101   :  { %1352 = vmatpush.xpose.msrb.mxu1 %v2141_v45  ;;  %v1521_v24 = vpop.eup %1520 }
 0x102   :  { %1309 = vmatpush.xpose.msrb.mxu0 %v2194_v44  ;;  %v724_v34 = vmul.f32 %v1521_v24, %v722_v12  ;;  %v2603_v44 = vld [vmem:[#allocation5_spill] sm:$0xff] }
 0x103   :  { %1462 = vmatpush.xpose.msrb.mxu3 %v2164_v54 }
 0x104   :  { %1405 = vmatpush.xpose.msrb.mxu2 %v2202_v59  ;;  %v725_v40 = vmul.f32 %v1521_v24, %v724_v34 }
 0x105   :  { %1354 = vmatpush.xpose.msrb.mxu1 %v2164_v54 }
 0x106   :  { %1312 = vmatpush.xpose.msrb.mxu0 %v2213_v13  ;;  %v726_v45 = vmul.f32 0.5, %v725_v40 }
 0x107   :  { %1464 = vmatpush.xpose.msrb.mxu3 %v2175_v60 }
 0x108   :  { %1409 = vmatpush.xpose.msrb.mxu2 %v2210_v6  ;;  %v727_v1 = vsub.f32 1.5, %v726_v45 }
 0x109   :  { %1356 = vmatpush.xpose.msrb.mxu1 %v2175_v60  ;;  %v733_v60 = vand.u32 2147483648, %v722_v12 }
 0x10a   :  { %1315 = vmatpush.xpose.msrb.mxu0 %v2239_v3  ;;  %v728_v52 = vmul.f32 %v1521_v24, %v727_v1 }
 0x10b   :  { %1466 = vmatpush.xpose.msrb.mxu3 %v2191_v32 }
 0x10c   :  { %1413 = vmatpush.xpose.msrb.mxu2 %v2230_v55  ;;  %v729_v54 = vmul.f32 %v728_v52, %v722_v12 }
 0x10d   :  { %1358 = vmatpush.xpose.msrb.mxu1 %v2191_v32 }
 0x10e   :  { %1318 = vmatpush.xpose.msrb.mxu0 %v2257_v17  ;;  %v731_v62 = vsel %vm730_vm1, %v722_v12, %v729_v54 }
 0x10f   :  { %1468 = vmatpush.xpose.msrb.mxu3 %v2221_v38  ;;  %v734_v63 = vsel %vm732_vm2, %v733_v60, %v731_v62 }
 0x110   :  { %1417 = vmatpush.xpose.msrb.mxu2 %v2251_v0  ;;  %v735_v32 = vadd.f32 1e-06, %v734_v63  ;;  %v2604_v0 = vld [vmem:[#allocation20_spill] sm:$0xff] }
 0x111   :  { %1360 = vmatpush.xpose.msrb.mxu1 %v2221_v38 }
 0x112   :  { %1321 = vmatpush.xpose.msrb.mxu0 %v2602_v22  ;;  %1522 = vrcp.f32 %v735_v32  ;;  %v747_v38 = vand.u32 2147483648, %v735_v32  ;;  %vm741_vm4 = vweird.f32 %v735_v32 }
 0x113   :  { %1470 = vmatpush.xpose.msrb.mxu3 %v2236_v15 }
 0x114   :  { %1421 = vmatpush.xpose.msrb.mxu2 %v2271_v33 }
 0x115   :  { %1362 = vmatpush.xpose.msrb.mxu1 %v2236_v15  ;;  %v745_v15 = vand.u32 2147483647, %v735_v32 }
 0x116   :  { %1324 = vmatpush.xpose.msrb.mxu0 %v2282_v46 }
 0x117   :  { %1472 = vmatpush.xpose.msrb.mxu3 %v2254_v16  ;;  %vm746_vm6 = vcmp.eq.f32.partialorder %v745_v15, 8.507059e+37 }
 0x118   :  { %1425 = vmatpush.xpose.msrb.mxu2 %v2290_v56  ;;  %v1523_v59 = vpop.eup %1522 }
 0x119   :  { %1364 = vmatpush.xpose.msrb.mxu1 %v2254_v16  ;;  %v737_v6 = vmul.f32 %v1523_v59, %v735_v32  ;;  %vm742_vm3 = vweird.f32 %v1523_v59  ;;  %v748_v16 = vor.u32 1.1754944e-38, %v747_v38 }
 0x11a   :  { %1327 = vmatpush.xpose.msrb.mxu0 %v2603_v44  ;;  %vm743_vm5 = vmor %vm741_vm4, %vm742_vm3 }
 0x11b   :  { %1474 = vmatpush.xpose.msrb.mxu3 %v2263_v23  ;;  %v738_v13 = vsub.f32 1.0, %v737_v6 }
 0x11c   :  { %1429 = vmatpush.xpose.msrb.mxu2 %v2300_v31 }
 0x11d   :  { %1366 = vmatpush.xpose.msrb.mxu1 %v2263_v23  ;;  %v739_v55 = vmul.f32 %v1523_v59, %v738_v13 }
 0x11e   :  { %1330 = vmatpush.xpose.msrb.mxu0 %v2329_v19 }
 0x11f   :  { %1476 = vmatpush.xpose.msrb.mxu3 %v2293_v57  ;;  %v740_v3 = vadd.f32 %v1523_v59, %v739_v55 }
 0x120   :  { %1433 = vmatpush.xpose.msrb.mxu2 %v2323_v5 }
 0x121   :  { %1368 = vmatpush.xpose.msrb.mxu1 %v2293_v57  ;;  %v744_v17 = vsel %vm743_vm5, %v1523_v59, %v740_v3 }
 0x122   :  { %1333 = vmatpush.xpose.msrb.mxu0 %v2347_v30  ;;  %v749_v23 = vsel %vm746_vm6, %v748_v16, %v744_v17 }
 0x123   :  { %1478 = vmatpush.xpose.msrb.mxu3 %v2308_v36  ;;  %v1145_v33 = vsel %vm751_vm0, %v749_v23, 0 }
 0x124   :  { %1437 = vmatpush.xpose.msrb.mxu2 %v2341_v51  ;;  %v1179_v46 = vand.u32 4294901760, %v1145_v33 }
 0x125   :  { %1370 = vmatpush.xpose.msrb.mxu1 %v2308_v36 }
 0x126   :  { %1336 = vmatpush.xpose.msrb.mxu0 %v2604_v0  ;;  %1285 = vmatmul.f32.vlgmr.msra.gmra.mxu3 %v1179_v46  ;;  %v1180_v56 = vsub.f32 %v1145_v33, %v1179_v46 }
 0x127   :  { %1480 = vmatpush.xpose.msrb.mxu3 %v2326_v11 }
 0x128   :  { %1441 = vmatpush.xpose.msrb.mxu2 %v2357_v42  ;;  %v1181_v57 = vand.u32 4294901760, %v1180_v56 }
 0x129   :  { %1372 = vmatpush.xpose.msrb.mxu1 %v2326_v11  ;;  %1339 = vmatmul.f32.vlgmr.msrb.gmra.mxu0 %v1180_v56 }
 0x12a   :  { %v1182_v31 = vsub.f32 %v1180_v56, %v1181_v57 }
 0x12b   :  { %1482 = vmatpush.xpose.msrb.mxu3 %v2344_v61 }
 0x12c   :  { %1445 = vmatpush.xpose.msrb.mxu2 %v2371_v7  ;;  %v1183_v36 = vand.u32 4294901760, %v1182_v31 }
 0x12d   :  { %1374 = vmatpush.xpose.msrb.mxu1 %v2344_v61 }
 0x12e   :  { %1184 = vmatmul.f32.vlgmr.msra.gmra.mxu2 %v1183_v36  ;;  %1484 = vmatmul.f32.vlgmr.msrb.gmra.mxu3 %v1179_v46 }
 0x130   :  { %1378 = vmatmul.f32.vlgmr.msrb.gmra.mxu1 %v1181_v57 }
 0x136   :  { %1447 = vmatmul.f32.vlgmr.msrb.gmra.mxu2 %v1179_v46 }
 0x150   :  { %v942_v11 = vpop.f32.mrf.mxu1 }
 0x158   :  { %v841_v5 = vpop.f32.mrf.mxu0  ;;  %v996_v19 = vpop.f32.mrf.mxu2 }
 0x159   :  { %v943_v42 = vadd.f32 %v942_v11, %v841_v5 }
 0x15b   :  { %v1035_v51 = vpop.f32.mrf.mxu3  ;;  %v997_v43 = vadd.f32 %v996_v19, %v943_v42 }
 0x15d   :  { %v1036_v27 = vadd.f32 %v1035_v51, %v997_v43 }
 0x166   :  { %v1104_v30 = vpop.f32.mrf.mxu0 }
 0x167   :  { %v1105_v58 = vadd.f32 %v1104_v30, %v1036_v27 }
 0x16d   :  { %v1141_v14 = vpop.f32.mrf.mxu1 }
 0x16e   :  { %v1142_v21 = vadd.f32 %v1141_v14, %v1105_v58 }
 0x170   :  { %v1489_v49 = vsub.f32 %v1524_v39, %v1142_v21 }
 0x1a6   :  { %v1340_v48 = vpop.f32.mrf.mxu0 }
 0x1a9   :  { %v1286_v9 = vpop.f32.mrf.mxu3 }
 0x1ad   :  { %v1379_v47 = vpop.f32.mrf.mxu1 }
 0x1b1   :  { %v1185_v61 = vpop.f32.mrf.mxu2  ;;  %v1485_v35 = vpop.f32.mrf.mxu3 }
 0x1b2   :  { %v1287_v41 = vadd.f32 %v1286_v9, %v1185_v61 }
 0x1b4   :  { %v1341_v7 = vadd.f32 %v1340_v48, %v1287_v41 }
 0x1b6   :  { %v1380_v53 = vadd.f32 %v1379_v47, %v1341_v7 }
 0x1b9   :  { %v1448_v50 = vpop.f32.mrf.mxu2 }
 0x1ba   :  { %v1449_v4 = vadd.f32 %v1448_v50, %v1380_v53 }
 0x1bc   :  { %v1486_v20 = vadd.f32 %v1485_v35, %v1449_v4 }
 0x1be   :  { %v1490_v8 = vmul.f32 %v1489_v49, %v1486_v20 }
 0x1c0   :  { %v1494_v10 = vmul.f32 %v1518_v28, %v1490_v8 }
 0x1c2   :  { %v1499_v37 = vadd.f32 %v1519_v25, %v1494_v10 }
 0x1c4   :  { %1500 = vst [vmem:[#allocation2] sm:$0xf] %v1499_v37 }
 0x1c5   :  { %1511 = dma.vmem_to_hbm [thread:$0]  %s1507_s29, 64, %s1509_s6, [#allocation3]  }
 0x1c6   :  { %1549 = dma.done.wait [#allocation3], 64  }
 0x1c7   :  { %1550 = vsyncadd [#allocation3], 4294967232 }
 0x1c8   :  { %1516 = vsyncpa [#allocation3], 1 }

</bundles_post_ra>
